<compile_context>
chip_gen: v6e
topology: v6e:2x2x1
jax: 0.10.0
libtpu: 0.0.40
codegen_flags: <defaults>
</compile_context>

<pallas_src>
import functools
import math

import jax
import jax.numpy as jnp
from jax.experimental import pallas as pl
from jax.experimental.pallas import tpu as pltpu


# ------------------------------ helpers ------------------------------

def _vmem_limit_bytes():
    # v7x: 64 MiB physical -> keep <= ~48 MiB; v5e/v6e: 128 MiB -> raise to 96 MiB.
    try:
        cap = pltpu.get_tpu_info().vmem_capacity_bytes
    except Exception:
        cap = 64 * 1024 * 1024
    return int(min(cap * 3 // 4, 96 * 1024 * 1024))


def _const_spec(shape):
    """Grid-invariant (weight) input: single-buffer it so it is not duplicated in VMEM."""
    nd = len(shape)
    idx = lambda *args, _nd=nd: (0,) * _nd
    try:
        return pl.BlockSpec(shape, idx, pipeline_mode=pl.Buffered(1))
    except Exception:                     # older jax without pipeline_mode / Buffered
        return pl.BlockSpec(shape, idx)


def _layer_norm(x, g, b, eps=1e-5):
    mu = jnp.mean(x, axis=-1, keepdims=True)
    var = jnp.mean((x - mu) ** 2, axis=-1, keepdims=True)
    return (x - mu) * jax.lax.rsqrt(var + eps) * g + b


# ------------------------------ Pallas kernels ------------------------------

def prep_kernel(t_ref, keep_ref, w_ref, vec_ref, pe_ref, o_ref):
    """in_proj + masked_fill(selection, 0) + positional encoding + fused CLS row.

    t_ref   : (1, P, K)       bf16 raw patches (one batch element per grid step)
    keep_ref: (1, P, 1)       f32  1.0 keep / 0.0 masked
    w_ref   : (K, D)          bf16 in_proj weight (pre-transposed)
    vec_ref : (8, D)          f32  row0 = in_proj bias, row1 = cls embedding
    pe_ref  : (P, D)          f32  absolute sinusoidal PE
    o_ref   : (1, S_pad, D)   bf16 row 0 = CLS, rows 1..P = patches, rest = 0
    """
    _, P, _ = t_ref.shape
    D = w_ref.shape[1]
    seq_pad = o_ref.shape[1]
    vec = vec_ref[...]
    in_b = vec[0:1]                              # (1, D)
    cls = vec[1:2]                               # (1, D)

    x = jnp.dot(t_ref[0], w_ref[...], preferred_element_type=jnp.float32) + in_b
    x = x * keep_ref[0]                          # masked_fill(selection_mask, 0)
    x = x + pe_ref[...]                          # PE added after the fill (matches ref)

    rows = [cls, x]
    pad_rows = seq_pad - (P + 1)
    if pad_rows > 0:
        rows.append(jnp.zeros((pad_rows, D), jnp.float32))
    # single aligned full-block store (no double store, no sublane-offset writes)
    o_ref[0] = jnp.concatenate(rows, axis=0).astype(o_ref.dtype)


def encoder_layer_kernel(x_ref, wqkv_ref, bqkv_ref, wo_ref, wl1_ref, wl2_ref,
                         vec_ref, o_ref, *, nhead, seq_valid):
    """One post-LN nn.TransformerEncoderLayer (batch_first, relu, eval mode)."""
    x = x_ref[0]                                 # (S, D) bf16
    S, D = x.shape
    dh = D // nhead
    x32 = x.astype(jnp.float32)

    vec = vec_ref[...]                           # (8, D) f32: packed per-layer vectors
    out_b, l1_b, l2_b = vec[0:1], vec[1:2], vec[2:3]
    g1, be1, g2, be2 = vec[3:4], vec[4:5], vec[5:6], vec[6:7]

    # ---- fused QKV: one lane-dense (S,D)x(D,3D) MXU matmul (f32 accumulate).
    #      The 1/sqrt(dh) scale is already folded into the Q weight/bias columns. ----
    qkv = jnp.dot(x, wqkv_ref[...], preferred_element_type=jnp.float32) + bqkv_ref[0]
    q = qkv[:, :D].astype(jnp.bfloat16)
    k = qkv[:, D:2 * D].astype(jnp.bfloat16)
    v = qkv[:, 2 * D:].astype(jnp.bfloat16)

    key_mask = jax.lax.broadcasted_iota(jnp.int32, (1, S), 1) < seq_valid

    # ---- per-head attention: static unrolled head loop, pure 2-D ops (no 3-D
    #      relayouts); softmax in f32 with an exact divide (torch parity). ----
    heads = []
    for h in range(nhead):
        sl = slice(h * dh, (h + 1) * dh)
        s = jax.lax.dot_general(q[:, sl], k[:, sl], (((1,), (1,)), ((), ())),
                                preferred_element_type=jnp.float32)      # (S, S)
        s = jnp.where(key_mask, s, -1e30)        # mask alignment-padding keys
        s = s - jnp.max(s, axis=-1, keepdims=True)
        p = jnp.exp(s)
        p = p / jnp.sum(p, axis=-1, keepdims=True)
        heads.append(jnp.dot(p.astype(jnp.bfloat16), v[:, sl],
                             preferred_element_type=jnp.float32))        # (S, dh)

    # ---- concat heads -> single full-K (S,D)x(D,D) out-projection ----
    a2d = jnp.concatenate(heads, axis=-1).astype(jnp.bfloat16)           # (S, D)
    attn = jnp.dot(a2d, wo_ref[...], preferred_element_type=jnp.float32) + out_b

    # ---- residual + LN + FFN(relu) + residual + LN (f32) ----
    y = _layer_norm(x32 + attn, g1, be1)
    hdn = jnp.dot(y.astype(jnp.bfloat16), wl1_ref[...],
                  preferred_element_type=jnp.float32) + l1_b
    hdn = jnp.maximum(hdn, 0.0)
    hdn = jnp.dot(hdn.astype(jnp.bfloat16), wl2_ref[...],
                  preferred_element_type=jnp.float32) + l2_b
    y = _layer_norm(y + hdn, g2, be2)
    o_ref[0] = y.astype(o_ref.dtype)


# ------------------------------ Pallas wrappers ------------------------------

def in_proj_prep(target_bf16, keep, w_in, prep_vec, pe, seq_pad):
    B, P, K = target_bf16.shape
    D = w_in.shape[1]
    return pl.pallas_call(
        prep_kernel,
        out_shape=jax.ShapeDtypeStruct((B, seq_pad, D), jnp.bfloat16),
        grid=(B,),
        in_specs=[
            pl.BlockSpec((1, P, K), lambda i: (i, 0, 0)),
            pl.BlockSpec((1, P, 1), lambda i: (i, 0, 0)),
            _const_spec((K, D)),
            _const_spec((8, D)),
            _const_spec((P, D)),
        ],
        out_specs=pl.BlockSpec((1, seq_pad, D), lambda i: (i, 0, 0)),
        compiler_params=pltpu.CompilerParams(
            dimension_semantics=("parallel",),
            vmem_limit_bytes=_vmem_limit_bytes()),
    )(target_bf16, keep, w_in, prep_vec, pe)


def encoder_layer(x, layer_params, *, nhead, seq_valid):
    B, S, D = x.shape
    kern = functools.partial(encoder_layer_kernel, nhead=nhead, seq_valid=seq_valid)
    return pl.pallas_call(
        kern,
        out_shape=jax.ShapeDtypeStruct((B, S, D), x.dtype),
        grid=(B,),
        in_specs=[pl.BlockSpec((1, S, D), lambda i: (i, 0, 0))]
                 + [_const_spec(a.shape) for a in layer_params],
        out_specs=pl.BlockSpec((1, S, D), lambda i: (i, 0, 0)),
        compiler_params=pltpu.CompilerParams(
            dimension_semantics=("parallel",),     # batch axis feeds both TCs on v7x
            vmem_limit_bytes=_vmem_limit_bytes()),
    )(x, *layer_params)


# ------------------------------ parameters ------------------------------

def init_params(key, in_channels, embedding_dim, frames_per_patch, nhead, num_layers):
    D = embedding_dim
    K = frames_per_patch * in_channels
    assert D % nhead == 0, "embedding_dim must be divisible by nhead"
    dh = D // nhead
    scale = 1.0 / math.sqrt(dh)
    keys = jax.random.split(key, 2 + num_layers)

    cls = jax.random.normal(keys[0], (D,), jnp.float32)            # cls_embedding.normal_()
    in_w = 0.02 * jax.random.normal(keys[1], (D, K), jnp.float32)  # Linear(K, D).weight
    in_b = jnp.zeros((D,), jnp.float32)
    prep_w = in_w.T.astype(jnp.bfloat16)                           # (K, D) bf16
    prep_vec = jnp.zeros((8, D), jnp.float32).at[0].set(in_b).at[1].set(cls)

    layers = []
    for l in range(num_layers):
        k1, k2, k3, k4, k5 = jax.random.split(keys[2 + l], 5)
        ipw = 0.02 * jax.random.normal(k1, (3 * D, D), jnp.float32)   # in_proj_weight
        ipb = 0.02 * jax.random.normal(k5, (3 * D,), jnp.float32)     # in_proj_bias
        ow = 0.02 * jax.random.normal(k2, (D, D), jnp.float32)        # out_proj.weight
        ob = jnp.zeros((D,), jnp.float32)
        w1 = 0.02 * jax.random.normal(k3, (D, D), jnp.float32)        # linear1 (ff = D)
        b1 = jnp.zeros((D,), jnp.float32)
        w2 = 0.02 * jax.random.normal(k4, (D, D), jnp.float32)        # linear2
        b2 = jnp.zeros((D,), jnp.float32)
        g1 = jnp.ones((D,), jnp.float32); be1 = jnp.zeros((D,), jnp.float32)
        g2 = jnp.ones((D,), jnp.float32); be2 = jnp.zeros((D,), jnp.float32)

        # Fused (D, 3D) QKV weight; 1/sqrt(dh) folded into Q columns and Q bias.
        w_qkv = jnp.concatenate([ipw[:D].T * scale, ipw[D:2 * D].T, ipw[2 * D:].T],
                                axis=1).astype(jnp.bfloat16)              # (D, 3D)
        b_qkv = jnp.concatenate([ipb[:D] * scale, ipb[D:2 * D], ipb[2 * D:]]
                                )[None, :].astype(jnp.float32)            # (1, 3D)
        wo = ow.T.astype(jnp.bfloat16)                                    # (D, D)
        wl1 = w1.T.astype(jnp.bfloat16)
        wl2 = w2.T.astype(jnp.bfloat16)
        vec8 = jnp.stack([ob, b1, b2, g1, be1, g2, be2,
                          jnp.zeros((D,), jnp.float32)], axis=0)          # packed (8, D)
        layers.append((w_qkv, b_qkv, wo, wl1, wl2, vec8))
    return prep_w, prep_vec, layers


# ------------------------------ forward ------------------------------

def generate_selection_mask(key, batch_size, num_patches, selection_rate, cluster_size):
    """torch.randperm scatter + F.fold cluster dilation, on device with jax.random."""
    P = num_patches
    num_masked = int(P * selection_rate)
    keys = jax.random.split(key, batch_size)

    def one(k):
        perm = jax.random.permutation(k, P)
        return jnp.zeros((P,), jnp.bool_).at[perm[:num_masked]].set(True)

    base = jax.vmap(one)(keys)                                   # (B, P)
    pad = cluster_size - 1
    p_left = pad // 2
    p_right = pad - p_left
    padded = jnp.pad(base, ((0, 0), (p_right, p_left)))
    sel = jnp.zeros((batch_size, P), jnp.bool_)
    for j in range(cluster_size):                                # cluster dilation
        sel = jnp.logical_or(sel, padded[:, j:j + P])
    return sel, num_masked


def forward(x, params, mask_key, *, frames_per_patch, nhead,
            selection_rate=0.15, cluster_size=3):
    prep_w, prep_vec, layers = params
    B, C, T = x.shape
    fpp = frames_per_patch
    P = (T - T % fpp) // fpp
    D = prep_vec.shape[1]
    K = fpp * C
    seq_valid = P + 1                         # CLS + patches
    seq_pad = ((seq_valid + 15) // 16) * 16   # bf16 sublane-packed sequence length

    # --- patchify (F.unfold equivalent): feature index = frame*C + channel ---
    xt = x[:, :, :P * fpp].reshape(B, C, P, fpp)
    target = jnp.transpose(xt, (0, 2, 3, 1)).reshape(B, P, K)    # f32 (returned)

    # --- selection mask (randperm + cluster dilation), on device ---
    sel, num_masked = generate_selection_mask(mask_key, B, P, selection_rate, cluster_size)
    keep = jnp.logical_not(sel)[:, :, None].astype(jnp.float32)          # (B, P, 1)

    # --- absolute sinusoidal positional encoding ---
    pos = jnp.arange(P, dtype=jnp.float32)[:, None]
    freq = jnp.exp(-jnp.log(10000.0) * (2.0 * (jnp.arange(D) // 2)).astype(jnp.float32) / D)
    ang = pos * freq[None, :]
    pe = jnp.where(jnp.arange(D)[None, :] % 2 == 0, jnp.sin(ang), jnp.cos(ang)).astype(jnp.float32)

    # --- Pallas: in_proj + masked_fill + PE + CLS row (bf16 input, batch-tiled) ---
    h = in_proj_prep(target.astype(jnp.bfloat16), keep, prep_w, prep_vec, pe, seq_pad)

    # --- Pallas: transformer encoder stack ---
    for lp in layers:
        h = encoder_layer(h, lp, nhead=nhead, seq_valid=seq_valid)
    h = h.astype(jnp.float32)

    cls_out = h[:, 0:1, :]
    tok_out = h[:, 1:P + 1, :]

    # --- masked_select + pad_sequence with a STATIC bound (no host sync) ---
    counts = jnp.sum(sel, axis=1).astype(jnp.int32)                      # (B,)
    max_static = max(1, min(P, num_masked * cluster_size))               # static upper bound
    pos_idx = jnp.broadcast_to(jnp.arange(P, dtype=jnp.int32)[None, :], (B, P))
    sort_key = jnp.where(sel, pos_idx, pos_idx + P)   # selected first, original order
    order = jnp.argsort(sort_key, axis=1)
    idx = order[:, :max_static]                                          # (B, max_static)
    valid = (jnp.arange(max_static)[None, :] < counts[:, None]).astype(jnp.float32)
    out_sel = jnp.take_along_axis(tok_out, idx[:, :, None], axis=1) * valid[:, :, None]
    tgt_sel = jnp.take_along_axis(target, idx[:, :, None], axis=1) * valid[:, :, None]

    output = jnp.concatenate([cls_out, out_sel], axis=1)                 # (B, 1+max_static, D)
    return output, tgt_sel, counts


# ------------------------------ demo ------------------------------

if __name__ == "__main__":
    B, C_in, T = 2, 4, 16
    frames_per_patch = 2          # -> P = 8 patches, K = 8 features per patch
    embedding_dim = 32
    nhead = 4                     # head dim = 8
    num_layers = 2

    root = jax.random.PRNGKey(0)
    kx, kp, km = jax.random.split(root, 3)
    x = jax.random.normal(kx, (B, C_in, T), jnp.float32)   # layout: (B, C_in, T)
    params = init_params(kp, C_in, embedding_dim, frames_per_patch, nhead, num_layers)

    out, tgt, length = forward(x, params, km,
                               frames_per_patch=frames_per_patch, nhead=nhead,
                               selection_rate=0.15, cluster_size=3)
    jax.block_until_ready((out, tgt, length))
    print("KERNEL_OK")
</pallas_src>

<mosaic_0001>
module attributes {stable_mosaic.version = 11 : i64} {
  func.func @prep_kernel(%arg0: i32, %arg1: memref<1x8x8xbf16, #tpu.memory_space<vmem>>, %arg2: memref<1x8x1xf32, #tpu.memory_space<vmem>>, %arg3: memref<8x32xbf16, #tpu.memory_space<vmem>>, %arg4: memref<8x32xf32, #tpu.memory_space<vmem>>, %arg5: memref<8x32xf32, #tpu.memory_space<vmem>>, %arg6: memref<1x16x32xbf16, #tpu.memory_space<vmem>>) attributes {dimension_semantics = [#tpu.dimension_semantics<parallel>], iteration_bounds = array<i64: 2>, scalar_prefetch = 0 : i64, scratch_operands = 0 : i64, tpu.core_type = #tpu.core_type<tc>, window_params = [{transform_indices = @transform_0, window_bounds = array<i64: 1, 8, 8>}, {transform_indices = @transform_1, window_bounds = array<i64: 1, 8, 1>}, {pipeline_mode = #tpu.pipeline_mode<synchronous>, transform_indices = @transform_2, window_bounds = array<i64: 8, 32>}, {pipeline_mode = #tpu.pipeline_mode<synchronous>, transform_indices = @transform_3, window_bounds = array<i64: 8, 32>}, {pipeline_mode = #tpu.pipeline_mode<synchronous>, transform_indices = @transform_4, window_bounds = array<i64: 8, 32>}, {transform_indices = @transform_5, window_bounds = array<i64: 1, 16, 32>}]} {
    %c0 = arith.constant 0 : index
    %c0_0 = arith.constant 0 : index
    %0 = vector.load %arg4[%c0, %c0_0] : memref<8x32xf32, #tpu.memory_space<vmem>>, vector<8x32xf32>
    %1 = vector.extract_strided_slice %0 {offsets = [0, 0], sizes = [1, 32], strides = [1, 1]} : vector<8x32xf32> to vector<1x32xf32>
    %2 = vector.extract_strided_slice %0 {offsets = [1, 0], sizes = [1, 32], strides = [1, 1]} : vector<8x32xf32> to vector<1x32xf32>
    %c0_1 = arith.constant 0 : index
    %c0_2 = arith.constant 0 : index
    %c0_3 = arith.constant 0 : index
    %3 = vector.load %arg1[%c0_1, %c0_2, %c0_3] : memref<1x8x8xbf16, #tpu.memory_space<vmem>>, vector<1x8x8xbf16>
    %4 = vector.shape_cast %3 : vector<1x8x8xbf16> to vector<8x8xbf16>
    %c0_4 = arith.constant 0 : index
    %c0_5 = arith.constant 0 : index
    %5 = vector.load %arg3[%c0_4, %c0_5] : memref<8x32xbf16, #tpu.memory_space<vmem>>, vector<8x32xbf16>
    %cst = arith.constant dense<0.000000e+00> : vector<8x32xf32>
    %6 = tpu.matmul %4, %5, %cst {dimension_numbers = #tpu.dot_dimension_numbers<[1], [0], [0], [1], [0, 0, 1, 1], [], []>} : vector<8x8xbf16>, vector<8x32xbf16>, vector<8x32xf32> -> vector<8x32xf32>
    %7 = vector.broadcast %1 : vector<1x32xf32> to vector<8x32xf32>
    %8 = arith.addf %6, %7 : vector<8x32xf32>
    %c0_6 = arith.constant 0 : index
    %c0_7 = arith.constant 0 : index
    %c0_8 = arith.constant 0 : index
    %9 = vector.load %arg2[%c0_6, %c0_7, %c0_8] : memref<1x8x1xf32, #tpu.memory_space<vmem>>, vector<1x8x1xf32>
    %10 = vector.shape_cast %9 : vector<1x8x1xf32> to vector<8x1xf32>
    %11 = vector.broadcast %10 : vector<8x1xf32> to vector<8x32xf32>
    %12 = arith.mulf %8, %11 : vector<8x32xf32>
    %c0_9 = arith.constant 0 : index
    %c0_10 = arith.constant 0 : index
    %13 = vector.load %arg5[%c0_9, %c0_10] : memref<8x32xf32, #tpu.memory_space<vmem>>, vector<8x32xf32>
    %14 = arith.addf %12, %13 : vector<8x32xf32>
    %cst_11 = arith.constant 0.000000e+00 : f32
    %15 = vector.broadcast %cst_11 : f32 to vector<7x32xf32>
    %16 = tpu.concatenate %2, %14, %15 in 0 : vector<1x32xf32>, vector<8x32xf32>, vector<7x32xf32> -> vector<16x32xf32>
    %17 = arith.truncf %16 : vector<16x32xf32> to vector<16x32xbf16>
    %c0_12 = arith.constant 0 : index
    %c0_13 = arith.constant 0 : index
    %c0_14 = arith.constant 0 : index
    %18 = vector.load %arg6[%c0_12, %c0_13, %c0_14] : memref<1x16x32xbf16, #tpu.memory_space<vmem>>, vector<1x16x32xbf16>
    %19 = vector.shape_cast %18 : vector<1x16x32xbf16> to vector<16x32xbf16>
    %20 = vector.shape_cast %17 : vector<16x32xbf16> to vector<1x16x32xbf16>
    tpu.vector_store %arg6[%c0_12, %c0_13, %c0_14], %20 {strides = array<i32>} : memref<1x16x32xbf16, #tpu.memory_space<vmem>>, vector<1x16x32xbf16>,
    return
  }
  func.func @transform_0(%arg0: i32) -> (i32, i32, i32) {
    %c0_i32 = arith.constant 0 : i32
    %c0_i32_0 = arith.constant 0 : i32
    %c0_i32_1 = arith.constant 0 : i32
    return %arg0, %c0_i32, %c0_i32_0 : i32, i32, i32
  }
  func.func @transform_1(%arg0: i32) -> (i32, i32, i32) {
    %c0_i32 = arith.constant 0 : i32
    %c0_i32_0 = arith.constant 0 : i32
    %c0_i32_1 = arith.constant 0 : i32
    return %arg0, %c0_i32, %c0_i32_0 : i32, i32, i32
  }
  func.func @transform_2(%arg0: i32) -> (i32, i32) {
    %c0_i32 = arith.constant 0 : i32
    %c0_i32_0 = arith.constant 0 : i32
    %c0_i32_1 = arith.constant 0 : i32
    return %c0_i32, %c0_i32_0 : i32, i32
  }
  func.func @transform_3(%arg0: i32) -> (i32, i32) {
    %c0_i32 = arith.constant 0 : i32
    %c0_i32_0 = arith.constant 0 : i32
    %c0_i32_1 = arith.constant 0 : i32
    return %c0_i32, %c0_i32_0 : i32, i32
  }
  func.func @transform_4(%arg0: i32) -> (i32, i32) {
    %c0_i32 = arith.constant 0 : i32
    %c0_i32_0 = arith.constant 0 : i32
    %c0_i32_1 = arith.constant 0 : i32
    return %c0_i32, %c0_i32_0 : i32, i32
  }
  func.func @transform_5(%arg0: i32) -> (i32, i32, i32) {
    %c0_i32 = arith.constant 0 : i32
    %c0_i32_0 = arith.constant 0 : i32
    %c0_i32_1 = arith.constant 0 : i32
    return %arg0, %c0_i32, %c0_i32_0 : i32, i32, i32
  }
}

</mosaic_0001>

<bundles_post_ra>
// kernel: tpu_custom_call.1
= control target key start
LH: loop header
LB: loop body
LE: loop exit
PB: predicated region body
PF: predicated region fallthrough
CT: control target
= control target key end

     0   :  { %10 = vsyncpa [#allocation3], 0  ;;  %s777_s0 = inlined_call_operand.vmem [shape: bf16[2,8,8], index: 0, kind: input, shape index: {}]   ;;  %s778_s1 = inlined_call_operand.vmem [shape: f32[2,8,1], index: 1, kind: input, shape index: {}]   ;;  %s779_s2 = inlined_call_operand.hbm [shape: bf16[8,32], index: 2, kind: input, shape index: {}]   ;;  %s780_s3 = inlined_call_operand.vmem [shape: f32[8,32], index: 3, kind: input, shape index: {}]   ;;  %s781_s4 = inlined_call_operand.vmem [shape: f32[8,32], index: 4, kind: input, shape index: {}]   ;;  %s782_s5 = inlined_call_operand.hbm [shape: bf16[2,16,32], index: 5, kind: output, shape index: {}]  }
   0x1   :  { %11 = vsyncpa [#allocation4], 0 }
   0x2   :  { %13 = vsyncpa [#allocation4 + $0x1], 0  ;;  %s648_s18 = smov 0   ;;  %s650_s19 = smov 0  }
   0x3   :  { %s652_s20 = smov 0   ;;  %s654_s21 = smov 0  }
   0x4 LB: > { %s669_s22 = sadd.s32 4294967295, %s609_s21   ;;  %s435_s23 = sadd.s32 4294967294, %s609_s21   ;;  %s609_s21 = sphi %s654_s21, %s790_s21   ;;  %s605_s20 = sphi %s652_s20, %s789_s20   ;;  %s601_s19 = sphi %s650_s19, %s788_s19   ;;  %s597_s18 = sphi %s648_s18, %s787_s18  }
   0x5   : > { %s673_s24 = sadd.s32 1, %s609_s21   ;;  %s141_s25 = sadd.s32 1, %s605_s20 }
   0x6   : > { %s138_s26 = ssub.s32 %s609_s21, %s673_s24  ;;  %p151_p0 = scmp.ne.s32.totalorder %s605_s20, %s601_s19 }
   0x7   : > { %p139_p1 = scmp.eq.s32.totalorder %s138_s26, 0  ;;  %p152_p2 = scmp.eq.s32.totalorder %s669_s22, 1 }
   0x8   : > { %p157_p3 = scmp.ne.s32.totalorder %s601_s19, %s597_s18  ;;  %p158_p4 = scmp.eq.s32.totalorder %s435_s23, 1 }
   0x9   : > { %s684_s27 = scalar_select %p139_p1, %s605_s20, %s141_s25  }
   0xa   : > { %p686_p5 = por %p152_p2, %p151_p0  ;;  %p690_p6 = por %p158_p4, %p157_p3 }
   0xb   : > { %p436_p7 = scmp.ge.s32.totalorder %s609_s21, 1  ;;  %p165_p8 = scmp.lt.s32.totalorder %s609_s21, 3 }
   0xc   : > { %s784_s29 = scalar_select %p690_p6, 1, 0 }
   0xd   : > { %p477_p9 = scmp.eq.s32.totalorder %s669_s22, 0  ;;  %p697_p10 = pnand %p436_p7, %p165_p8 }
   0xe   : > { %s611_s6 = smov [#allocation2]  }
   0xf   : > { %s178_s7 = sshll.u32 %s611_s6, 4  ;;  %p469_p11 = pneg %p697_p10  ;;  %s179_s7 = int_to_ptr.vmem [resolvable:$true] %s178_s7 }
  0x10   : > { %s530_s8 = scalar_lea.vmem %s179_s7, 64  ;;  %p538_p3 = scmp.lt.s32.totalorder %s179_s7, %s179_s7 }
  0x11   : > { %p470_p12 = pnand %p477_p9, %p469_p11  ;;  %p531_p0 = scmp.ne.s32.totalorder %s179_s7, %s530_s8 }
  0x12   : > { %p539_p4 = scmp.lt.s32.totalorder %s530_s8, %s530_s8 }
  0x13   : > { %p521_p13 = pneg %p470_p12 }
  0x14   : > { %p540_p6 = por %p539_p4, %p538_p3 }
  0x15   : > { %p533_p1 = pnand %p531_p0, %p521_p13 }
  0x17   : > { %p534_p2 = pneg %p533_p1 }
  0x19   : > { %p541_p7 = pnand %p540_p6, %p534_p2 }
  0x1b   : > { %544 = shalt.err (!%p541_p7)
}
  0x1c   : > { %472 = dma.hbm_to_vmem [thread:$0]  (!%p470_p12), %s779_s2, 64, %s179_s7, [#allocation3]  }
  0x1d   : > { %211 = sbr.rel (%p697_p10) target bundleno = 261 (0x105), region = 40 }
  0x22   : > { %588 = dma.done.wait (%p477_p9), [#allocation3], 64  }
  0x23   : > { %590 = vsyncadd (%p477_p9), [#allocation3], 4294967232  ;;  %p242_p8 = scmp.lt.s32.totalorder %s669_s22, 1  ;;  %v612_v0 = vmov 0.0   ;;  %vm613_vm0 = vmmov 0   ;;  %v614_v1 = vmov 0   ;;  %v254_v6 = vlaneseq }
  0x24   : > { %457 = vmatprep.subr.bf16.mxu0 %v612_v0  ;;  %459 = vmatprep.mubr.msk.bf16.mxu0 %vm613_vm0, %v612_v0  ;;  %vm262_vm1 = vcmask 1043456   ;;  %v253_v2 = vld [vmem:[#allocation2] sm:$0xf]  ;;  %vm258_vm2 = vcmask 64512   ;;  %s239_s6 = sand.u32 1, %s601_s19   ;;  %vm321_vm3 = vcmask 1040384  }
  0x25   : > { %s243_s11 = scalar_select %p242_p8, %s669_s22, 1  ;;  %518 = vset.pattern.permute.xlu0 %v614_v1  ;;  %v264_v4 = vsel %vm262_vm1, %v253_v2, 0  ;;  %v255_v7 = vshrl.u32 %v254_v6, 7  ;;  %v251_v9 = vld [vmem:[%s780_s3] sm:$0xff]  ;;  %vm332_vm4 = vcmask 257024  }
  0x26   : > { %458 = vmatpush3.bf16.msra.mxu0 %v264_v4  ;;  %s441_s7 = sshll.u32 %s239_s6, 3  ;;  %v313_v14 = vld [vmem:[%s781_s4] sm:$0xff]  ;;  %v316_v18 = vrot.slane %v251_v9, 1  ;;  %s454_s10 = sshll.u32 %s669_s22, 7 }
  0x27   : > { %s442_s12 = sshll.u32 %s243_s11, 2  ;;  %s443_s13 = sshll.u32 %s243_s11, 3  ;;  %v256_v8 = vsub.s32 0, %v255_v7 }
  0x28   : > { %s249_s16 = scalar_lea.vmem %s778_s1, %s443_s13  ;;  %s245_s25 = scalar_lea.vmem %s777_s0, %s442_s12 }
  0x29   : > { %v306_v3 = vld [vmem:[%s249_s16] sm:$0xff]  ;;  %v257_v10 = vrot.slane %v251_v9, %v256_v8  ;;  %s241_s11 = scalar_lea.vmem [#allocation5], %s441_s7  ;;  %s733_s15 = scalar_lea.hbm %s782_s5, %s454_s10 }
  0x2a   : > { %309 = vperm.xlu0 %518, %v306_v3   ;;  %v252_v5 = vld [vmem:[%s245_s25] sm:$0xf]  ;;  %s349_s12 = sshll.u32 %s241_s11, 4  ;;  %s737_s22 = scalar_lea.sflag [#allocation4], %s239_s6  ;;  %s735_s12 = int_to_ptr.vmem [resolvable:$true] %s349_s12 }
  0x2b   : > { %460 = vmatmul.mubr.msk.bf16.vlgmr.msra.gmra.mxu0 %vm258_vm2, %v252_v5  ;;  %s545_s16 = scalar_lea.vmem %s735_s12, 128  ;;  %s615_s17 = smov [#allocation5]  }
  0x2c   : > { %p546_p6 = scmp.ne.s32.totalorder %s735_s12, %s545_s16  ;;  %s549_s23 = sshll.u32 %s615_s17, 4  ;;  %s550_s23 = int_to_ptr.vmem [resolvable:$false] %s549_s23 }
  0x2d   : > { %s551_s25 = scalar_lea.vmem %s550_s23, 256  ;;  %p552_p11 = scmp.lt.s32.totalorder %s735_s12, %s550_s23 }
  0x2e   : > { %p547_p9 = pnand %p546_p6, %p686_p5  ;;  %p553_p12 = scmp.lt.s32.totalorder %s551_s25, %s545_s16 }
  0x30   : > { %p548_p10 = pneg %p547_p9  ;;  %p554_p13 = por %p553_p12, %p552_p11 }
  0x32   : > { %p555_p0 = pnand %p554_p13, %p548_p10 }
  0xa5   : > { %v310_v12 = vpop.permute.xlu0 %309 }
  0xeb   : > { %v300_v11 = vpop.f32.mrf.mxu0 }
  0xec   : > { %v301_v13 = vadd.f32 %v300_v11, %v257_v10 }
  0xed   : > { %v461_v15 = vpop.f32.mrf.mxu0 }
  0xee   : > { %v312_v16 = vmul.f32 %v310_v12, %v301_v13 }
  0xef   : > { %v303_v17 = vpop.f32.mrf.mxu0 }
  0xf0   : > { %v314_v19 = vadd.f32 %v313_v14, %v312_v16 }
  0xf1   : > { %v462_v20 = vpop.f32.mrf.mxu0 }
  0xf2   : > { %v319_v21 = vrot.slane %v314_v19, 7 }
  0xf4   : > { %v322_v22 = vsel %vm321_vm3, %v316_v18, %v319_v21  ;;  %v323_v23 = vsel %vm321_vm3, %v319_v21, 0.0 }
  0xf5   : > { %v452_v24 = vpack.c.bf16 %v322_v22, %v322_v22  ;;  %v453_v25 = vpack.c.bf16 %v323_v23, %v323_v23 }
  0xf7   : > { %334 = vst.msk [vmem:[%s241_s11 + $0x4] sm:$0xf] %vm332_vm4, %v453_v25  ;;  %333 = vst.msk [vmem:[%s241_s11] sm:$0xf] %vm332_vm4, %v452_v24 }
  0xf8   : > { %558 = shalt.err (!%p555_p0)
}
  0xf9   : > { %s559_s26 = scalar_lea.hbm %s733_s15, 128  ;;  %s563_s7 = scalar_lea.hbm %s782_s5, 256 }
  0xfa   : > { %p560_p1 = scmp.ne.s32.totalorder %s733_s15, %s559_s26  ;;  %p564_p4 = scmp.lt.s32.totalorder %s733_s15, %s782_s5 }
  0xfb   : > { %p565_p7 = scmp.lt.s32.totalorder %s563_s7, %s559_s26 }
  0xfc   : > { %p561_p2 = pnand %p560_p1, %p686_p5 }
  0xfd   : > { %p566_p8 = por %p565_p7, %p564_p4 }
  0xfe   : > { %p562_p3 = pneg %p561_p2 }
 0x100   : > { %p567_p6 = pnand %p566_p8, %p562_p3 }
 0x102   : > { %570 = shalt.err (!%p567_p6)
}
 0x103   : > { %s616_s10 = smov 64   ;;  %s617_s11 = smov 4  }
 0x104   : > { %467 = dma.vmem_to_hbm [thread:$0]  (%p686_p5), %s735_s12, 128, %s733_s15, %s737_s22, %s616_s10, %s616_s10, %s617_s11  }
 0x105 PF: > { %p479_p9 = scmp.ge.s32.totalorder %s609_s21, 2  ;;  %s364_s13 = sand.u32 1, %s597_s18  }
 0x106   : > { %p786_p10 = scmp.ne.s32.totalorder %s784_s29, 0  ;;  %s365_s14 = scalar_lea.sflag [#allocation4], %s364_s13 }
 0x108   : > { %p474_p11 = pnand %p479_p9, %p786_p10 }
 0x10a   : > { %p475_p12 = pneg %p474_p11 }
 0x10c   : > { %592 = dma.done.wait (%p475_p12), %s365_s14, 128  }
 0x10d   : > { %594 = vsyncadd (%p475_p12), %s365_s14, 4294967168  ;;  %p16_p13 = scmp.ge.s32.totalorder %s673_s24, 4   ;;  %s787_s18 = smov %s601_s19 }
 0x10e   : > { %s788_s19 = smov %s605_s20  ;;  %s789_s20 = smov %s684_s27 }
 0x10f   : > { %s790_s21 = smov %s673_s24  ;;  %18 = sbr.rel (!%p16_p13) target bundleno = 4 (0x4), region = 83 }
 0x114   :  { %370 = vsyncpa [#allocation3], 1 }
 0x115   :  { %372 = vsyncpa [#allocation3 + $0x1], 1 }
 0x116   :  { %373 = vsyncpa [#allocation4], 1 }
 0x117   :  { %375 = vsyncpa [#allocation4 + $0x1], 1 }

</bundles_post_ra>
